<compile_context>
chip_gen: v6e
topology: v6e:2x2x1
jax: 0.10.0
libtpu: 0.0.40
codegen_flags: <defaults>
</compile_context>

<pallas_src>
import functools

import jax
import jax.numpy as jnp
from jax.experimental import pallas as pl
from jax.experimental.pallas import tpu as pltpu

NUM_NEURONS = 256


def _round_up(x, m):
    return ((x + m - 1) // m) * m


def _cdiv(a, b):
    return (a + b - 1) // b


def policy_net_kernel(state_ref, w1_ref, b1_ref, w2_ref, b2_ref,
                      wh_ref, bh_ref, out_ref, *, action_dim):
    """Fused MLP (transposed dataflow): fc1 -> relu -> fc2 -> relu -> heads.

    Shapes (F = features on sublanes, B = batch on lanes):
      state_ref : (state_dim, tile_b)      compute dtype (bf16 default)
      w1_ref    : (256, state_dim)         compute dtype
      w2_ref    : (256, 256)               compute dtype
      wh_ref    : (head_rows, 256)         compute dtype (mu rows then log_sigma rows)
      b*_ref    : (out_features, 1)        float32
      out_ref   : (head_rows, tile_b)      float32
    """
    wdt = w1_ref.dtype  # matmul operand dtype; accumulation is always f32
    x = state_ref[...]

    # fc1 + ReLU : (256, sd) @ (sd, tile_b)
    h1 = jnp.dot(w1_ref[...], x, preferred_element_type=jnp.float32) + b1_ref[...]
    h1 = jnp.maximum(h1, 0.0)

    # fc2 + ReLU : (256, 256) @ (256, tile_b)
    h2 = jnp.dot(w2_ref[...], h1.astype(wdt),
                 preferred_element_type=jnp.float32) + b2_ref[...]
    h2 = jnp.maximum(h2, 0.0)

    # Fused head matmul: rows [0:action_dim] = mu head, rows
    # [action_dim:2*action_dim] = log_sigma head, remaining rows = padding.
    heads = jnp.dot(wh_ref[...], h2.astype(wdt),
                    preferred_element_type=jnp.float32) + bh_ref[...]

    mu = 5.0 * jnp.tanh(heads)                     # EUP
    sigma = jnp.logaddexp(heads, 0.0) + 1e-05      # stable softplus, EUP

    # Per-row (sublane) select between the two epilogues; padding rows are
    # finite and sliced off in the wrapper.
    row = jax.lax.broadcasted_iota(jnp.int32, heads.shape, 0)
    out_ref[...] = jnp.where(row < action_dim, mu, sigma)


def pack_params(params, weight_dtype=jnp.bfloat16):
    """Fuse the two head layers into one sublane-padded weight/bias.

    `params` uses PyTorch nn.Linear layout: w (out, in), b (out,).
    Biases stay float32 (added after the f32 accumulation).
    """
    action_dim = params["wmu"].shape[0]
    head_rows = _round_up(2 * action_dim, 8)

    wh = jnp.zeros((head_rows, NUM_NEURONS), jnp.float32)
    wh = wh.at[:action_dim].set(params["wmu"])
    wh = wh.at[action_dim:2 * action_dim].set(params["wls"])
    bh = jnp.zeros((head_rows, 1), jnp.float32)
    bh = bh.at[:action_dim, 0].set(params["bmu"])
    bh = bh.at[action_dim:2 * action_dim, 0].set(params["bls"])

    return dict(
        w1=params["w1"].astype(weight_dtype), b1=params["b1"].reshape(-1, 1),
        w2=params["w2"].astype(weight_dtype), b2=params["b2"].reshape(-1, 1),
        wh=wh.astype(weight_dtype), bh=bh,
    )


def _choose_tiling(batch, max_tile_b):
    """Pick (tile_b, b_pad, n_tiles) in 128-row granules.

    >= 2 grid steps whenever batch > 128 (so v7x's two TensorCores both get
    work), padding waste bounded by one granule per tile (~3% at large batch).
    """
    chunks = _cdiv(max(batch, 1), 128)
    max_chunks = max(1, max_tile_b // 128)
    n_tiles = 1 if chunks <= 1 else max(2, _cdiv(chunks, max_chunks))
    chunks_per_tile = _cdiv(chunks, n_tiles)
    tile_b = chunks_per_tile * 128
    return tile_b, tile_b * n_tiles, n_tiles


def policy_net_forward(state, packed, *, action_dim, max_tile_b=4096):
    """state: (B, state_dim) float32. packed: output of pack_params."""
    B, state_dim = state.shape
    head_rows = packed["wh"].shape[0]
    compute_dtype = packed["w1"].dtype

    tile_b, b_pad, n_tiles = _choose_tiling(B, max_tile_b)

    # Batch onto the lane axis; cast to the matmul operand dtype once here.
    state_t = jnp.pad(state.astype(compute_dtype).T, ((0, 0), (0, b_pad - B)))

    kernel = functools.partial(policy_net_kernel, action_dim=action_dim)
    resident = lambda i: (0, 0)  # constant block index -> copied once, stays in VMEM

    out_t = pl.pallas_call(
        kernel,
        out_shape=jax.ShapeDtypeStruct((head_rows, b_pad), jnp.float32),
        grid=(n_tiles,),
        in_specs=[
            pl.BlockSpec((state_dim, tile_b), lambda i: (0, i)),
            pl.BlockSpec((NUM_NEURONS, state_dim), resident),
            pl.BlockSpec((NUM_NEURONS, 1), resident),
            pl.BlockSpec((NUM_NEURONS, NUM_NEURONS), resident),
            pl.BlockSpec((NUM_NEURONS, 1), resident),
            pl.BlockSpec((head_rows, NUM_NEURONS), resident),
            pl.BlockSpec((head_rows, 1), resident),
        ],
        out_specs=pl.BlockSpec((head_rows, tile_b), lambda i: (0, i)),
        compiler_params=pltpu.CompilerParams(
            dimension_semantics=("parallel",),
            # Actual footprint at tile_b=4096 is ~9 MB; keep headroom below
            # v7x's 64 MiB physical VMEM while allowing bigger future tiles.
            vmem_limit_bytes=48 * 1024 * 1024,
        ),
    )(
        state_t,
        packed["w1"], packed["b1"],
        packed["w2"], packed["b2"],
        packed["wh"], packed["bh"],
    )

    # Narrow output: only head_rows * B * 4 bytes ever leave the kernel.
    mu = out_t[:action_dim, :B].T
    sigma = out_t[action_dim:2 * action_dim, :B].T
    return mu, sigma


def init_params(key, state_dim, action_dim):
    """PyTorch-style uniform(-1/sqrt(fan_in), 1/sqrt(fan_in)) init, (out, in) layout."""
    def linear(k, fan_in, fan_out):
        kw, kb = jax.random.split(k)
        bound = 1.0 / (fan_in ** 0.5)
        w = jax.random.uniform(kw, (fan_out, fan_in), jnp.float32, -bound, bound)
        b = jax.random.uniform(kb, (fan_out,), jnp.float32, -bound, bound)
        return w, b

    k1, k2, k3, k4 = jax.random.split(key, 4)
    w1, b1 = linear(k1, state_dim, NUM_NEURONS)
    w2, b2 = linear(k2, NUM_NEURONS, NUM_NEURONS)
    wmu, bmu = linear(k3, NUM_NEURONS, action_dim)
    wls, bls = linear(k4, NUM_NEURONS, action_dim)
    return dict(w1=w1, b1=b1, w2=w2, b2=b2,
                wmu=wmu, bmu=bmu, wls=wls, bls=bls)


def reference_forward(state, p):
    """Plain-JAX reference mirroring the PyTorch forward (f32 everywhere)."""
    h1 = jax.nn.relu(state @ p["w1"].T + p["b1"])
    h2 = jax.nn.relu(h1 @ p["w2"].T + p["b2"])
    mu = 5.0 * jnp.tanh(h2 @ p["wmu"].T + p["bmu"])
    sigma = jax.nn.softplus(h2 @ p["wls"].T + p["bls"]) + 1e-05
    return mu, sigma


# TODO(synk): add_noise_to_target (torch.normal injection with noise_std) is not
# part of forward(); it is intentionally omitted from the kernel.

if __name__ == "__main__":
    key = jax.random.PRNGKey(0)
    k_params, k_state1, k_state2 = jax.random.split(key, 3)

    state_dim, action_dim = 8, 4
    params = init_params(k_params, state_dim, action_dim)

    fwd = jax.jit(functools.partial(policy_net_forward, action_dim=action_dim))

    # Check 1: f32 weights/operands, tiny single-tile batch.
    state_small = jax.random.normal(k_state1, (8, state_dim), jnp.float32)
    packed_f32 = pack_params(params, weight_dtype=jnp.float32)
    mu, sigma = jax.block_until_ready(fwd(state_small, packed_f32))
    mu_ref, sigma_ref = reference_forward(state_small, params)
    assert jnp.allclose(mu, mu_ref, atol=1e-2, rtol=1e-2)
    assert jnp.allclose(sigma, sigma_ref, atol=1e-2, rtol=1e-2)

    # Check 2: default bf16 weights/operands (f32 accumulation), multi-tile
    # batch exercising the 2-step parallel grid; looser tolerance for bf16.
    state_big = jax.random.normal(k_state2, (260, state_dim), jnp.float32)
    packed_bf16 = pack_params(params)  # bf16 default
    mu, sigma = jax.block_until_ready(fwd(state_big, packed_bf16))
    mu_ref, sigma_ref = reference_forward(state_big, params)
    assert jnp.allclose(mu, mu_ref, atol=5e-2, rtol=5e-2)
    assert jnp.allclose(sigma, sigma_ref, atol=5e-2, rtol=5e-2)

    print("KERNEL_OK")
</pallas_src>

<mosaic_0001>
module attributes {stable_mosaic.version = 11 : i64} {
  func.func @policy_net_kernel(%arg0: i32, %arg1: memref<8x128xf32, #tpu.memory_space<vmem>>, %arg2: memref<256x8xf32, #tpu.memory_space<vmem>>, %arg3: memref<256x1xf32, #tpu.memory_space<vmem>>, %arg4: memref<256x256xf32, #tpu.memory_space<vmem>>, %arg5: memref<256x1xf32, #tpu.memory_space<vmem>>, %arg6: memref<8x256xf32, #tpu.memory_space<vmem>>, %arg7: memref<8x1xf32, #tpu.memory_space<vmem>>, %arg8: memref<8x128xf32, #tpu.memory_space<vmem>>) attributes {dimension_semantics = [#tpu.dimension_semantics<parallel>], iteration_bounds = array<i64: 1>, scalar_prefetch = 0 : i64, scratch_operands = 0 : i64, tpu.core_type = #tpu.core_type<tc>, window_params = [{transform_indices = @transform_0, window_bounds = array<i64: 8, 128>}, {pipeline_mode = #tpu.pipeline_mode<synchronous>, transform_indices = @transform_1, window_bounds = array<i64: 256, 8>}, {pipeline_mode = #tpu.pipeline_mode<synchronous>, transform_indices = @transform_2, window_bounds = array<i64: 256, 1>}, {pipeline_mode = #tpu.pipeline_mode<synchronous>, transform_indices = @transform_3, window_bounds = array<i64: 256, 256>}, {pipeline_mode = #tpu.pipeline_mode<synchronous>, transform_indices = @transform_4, window_bounds = array<i64: 256, 1>}, {pipeline_mode = #tpu.pipeline_mode<synchronous>, transform_indices = @transform_5, window_bounds = array<i64: 8, 256>}, {pipeline_mode = #tpu.pipeline_mode<synchronous>, transform_indices = @transform_6, window_bounds = array<i64: 8, 1>}, {transform_indices = @transform_7, window_bounds = array<i64: 8, 128>}]} {
    %c0 = arith.constant 0 : index
    %c0_0 = arith.constant 0 : index
    %0 = vector.load %arg1[%c0, %c0_0] : memref<8x128xf32, #tpu.memory_space<vmem>>, vector<8x128xf32>
    %c0_1 = arith.constant 0 : index
    %c0_2 = arith.constant 0 : index
    %1 = vector.load %arg2[%c0_1, %c0_2] : memref<256x8xf32, #tpu.memory_space<vmem>>, vector<256x8xf32>
    %cst = arith.constant dense<0.000000e+00> : vector<256x128xf32>
    %2 = tpu.matmul %1, %0, %cst {dimension_numbers = #tpu.dot_dimension_numbers<[1], [0], [0], [1], [0, 0, 1, 1], [], []>} : vector<256x8xf32>, vector<8x128xf32>, vector<256x128xf32> -> vector<256x128xf32>
    %c0_3 = arith.constant 0 : index
    %c0_4 = arith.constant 0 : index
    %3 = vector.load %arg3[%c0_3, %c0_4] : memref<256x1xf32, #tpu.memory_space<vmem>>, vector<256x1xf32>
    %4 = vector.broadcast %3 : vector<256x1xf32> to vector<256x128xf32>
    %5 = arith.addf %2, %4 : vector<256x128xf32>
    %cst_5 = arith.constant 0.000000e+00 : f32
    %6 = vector.broadcast %cst_5 : f32 to vector<256x128xf32>
    %7 = arith.maximumf %5, %6 : vector<256x128xf32>
    %c0_6 = arith.constant 0 : index
    %c0_7 = arith.constant 0 : index
    %8 = vector.load %arg4[%c0_6, %c0_7] : memref<256x256xf32, #tpu.memory_space<vmem>>, vector<256x256xf32>
    %cst_8 = arith.constant dense<0.000000e+00> : vector<256x128xf32>
    %9 = tpu.matmul %8, %7, %cst_8 {dimension_numbers = #tpu.dot_dimension_numbers<[1], [0], [0], [1], [0, 0, 1, 1], [], []>} : vector<256x256xf32>, vector<256x128xf32>, vector<256x128xf32> -> vector<256x128xf32>
    %c0_9 = arith.constant 0 : index
    %c0_10 = arith.constant 0 : index
    %10 = vector.load %arg5[%c0_9, %c0_10] : memref<256x1xf32, #tpu.memory_space<vmem>>, vector<256x1xf32>
    %11 = vector.broadcast %10 : vector<256x1xf32> to vector<256x128xf32>
    %12 = arith.addf %9, %11 : vector<256x128xf32>
    %cst_11 = arith.constant 0.000000e+00 : f32
    %13 = vector.broadcast %cst_11 : f32 to vector<256x128xf32>
    %14 = arith.maximumf %12, %13 : vector<256x128xf32>
    %c0_12 = arith.constant 0 : index
    %c0_13 = arith.constant 0 : index
    %15 = vector.load %arg6[%c0_12, %c0_13] : memref<8x256xf32, #tpu.memory_space<vmem>>, vector<8x256xf32>
    %cst_14 = arith.constant dense<0.000000e+00> : vector<8x128xf32>
    %16 = tpu.matmul %15, %14, %cst_14 {dimension_numbers = #tpu.dot_dimension_numbers<[1], [0], [0], [1], [0, 0, 1, 1], [], []>} : vector<8x256xf32>, vector<256x128xf32>, vector<8x128xf32> -> vector<8x128xf32>
    %c0_15 = arith.constant 0 : index
    %c0_16 = arith.constant 0 : index
    %17 = vector.load %arg7[%c0_15, %c0_16] : memref<8x1xf32, #tpu.memory_space<vmem>>, vector<8x1xf32>
    %18 = vector.broadcast %17 : vector<8x1xf32> to vector<8x128xf32>
    %19 = arith.addf %16, %18 : vector<8x128xf32>
    %20 = math.tanh %19 : vector<8x128xf32>
    %cst_17 = arith.constant 5.000000e+00 : f32
    %21 = vector.broadcast %cst_17 : f32 to vector<8x128xf32>
    %22 = arith.mulf %21, %20 : vector<8x128xf32>
    %cst_18 = arith.constant 0.000000e+00 : f32
    %23 = vector.broadcast %cst_18 : f32 to vector<8x128xf32>
    %24 = arith.maximumf %19, %23 : vector<8x128xf32>
    %25 = vector.broadcast %cst_18 : f32 to vector<8x128xf32>
    %26 = arith.subf %19, %25 : vector<8x128xf32>
    %27 = arith.cmpf one, %26, %26 : vector<8x128xf32>
    %28 = vector.broadcast %cst_18 : f32 to vector<8x128xf32>
    %29 = arith.addf %19, %28 : vector<8x128xf32>
    %30 = math.absf %26 : vector<8x128xf32>
    %cst_19 = arith.constant 0.000000e+00 : f32
    %31 = vector.broadcast %cst_19 : f32 to vector<8x128xf32>
    %32 = arith.subf %31, %30 : vector<8x128xf32>
    %33 = math.exp %32 : vector<8x128xf32>
    %34 = math.log1p %33 : vector<8x128xf32>
    %35 = arith.addf %24, %34 : vector<8x128xf32>
    %36 = arith.select %27, %29, %35 : vector<8x128xi1>, vector<8x128xf32>
    %cst_20 = arith.constant 9.99999974E-6 : f32
    %37 = vector.broadcast %cst_20 : f32 to vector<8x128xf32>
    %38 = arith.addf %36, %37 : vector<8x128xf32>
    %39 = tpu.iota {dimensions = array<i32: 0>} : vector<8x128xi32>
    %c4_i32 = arith.constant 4 : i32
    %40 = vector.broadcast %c4_i32 : i32 to vector<8x128xi32>
    %41 = arith.cmpi slt, %39, %40 : vector<8x128xi32>
    %42 = arith.select %41, %22, %38 : vector<8x128xi1>, vector<8x128xf32>
    %c0_21 = arith.constant 0 : index
    %c0_22 = arith.constant 0 : index
    %43 = vector.load %arg8[%c0_21, %c0_22] : memref<8x128xf32, #tpu.memory_space<vmem>>, vector<8x128xf32>
    tpu.vector_store %arg8[%c0_21, %c0_22], %42 {strides = array<i32>} : memref<8x128xf32, #tpu.memory_space<vmem>>, vector<8x128xf32>,
    return
  }
  func.func @transform_0(%arg0: i32) -> (i32, i32) {
    %c0_i32 = arith.constant 0 : i32
    %c0_i32_0 = arith.constant 0 : i32
    return %c0_i32, %arg0 : i32, i32
  }
  func.func @transform_1(%arg0: i32) -> (i32, i32) {
    %c0_i32 = arith.constant 0 : i32
    %c0_i32_0 = arith.constant 0 : i32
    %c0_i32_1 = arith.constant 0 : i32
    return %c0_i32, %c0_i32_0 : i32, i32
  }
  func.func @transform_2(%arg0: i32) -> (i32, i32) {
    %c0_i32 = arith.constant 0 : i32
    %c0_i32_0 = arith.constant 0 : i32
    %c0_i32_1 = arith.constant 0 : i32
    return %c0_i32, %c0_i32_0 : i32, i32
  }
  func.func @transform_3(%arg0: i32) -> (i32, i32) {
    %c0_i32 = arith.constant 0 : i32
    %c0_i32_0 = arith.constant 0 : i32
    %c0_i32_1 = arith.constant 0 : i32
    return %c0_i32, %c0_i32_0 : i32, i32
  }
  func.func @transform_4(%arg0: i32) -> (i32, i32) {
    %c0_i32 = arith.constant 0 : i32
    %c0_i32_0 = arith.constant 0 : i32
    %c0_i32_1 = arith.constant 0 : i32
    return %c0_i32, %c0_i32_0 : i32, i32
  }
  func.func @transform_5(%arg0: i32) -> (i32, i32) {
    %c0_i32 = arith.constant 0 : i32
    %c0_i32_0 = arith.constant 0 : i32
    %c0_i32_1 = arith.constant 0 : i32
    return %c0_i32, %c0_i32_0 : i32, i32
  }
  func.func @transform_6(%arg0: i32) -> (i32, i32) {
    %c0_i32 = arith.constant 0 : i32
    %c0_i32_0 = arith.constant 0 : i32
    %c0_i32_1 = arith.constant 0 : i32
    return %c0_i32, %c0_i32_0 : i32, i32
  }
  func.func @transform_7(%arg0: i32) -> (i32, i32) {
    %c0_i32 = arith.constant 0 : i32
    %c0_i32_0 = arith.constant 0 : i32
    return %c0_i32, %arg0 : i32, i32
  }
}

</mosaic_0001>

<bundles_post_ra>
// kernel: policy_net_forward.1
= control target key start
LH: loop header
LB: loop body
LE: loop exit
PB: predicated region body
PF: predicated region fallthrough
CT: control target
= control target key end

     0   :  { %vm251_vm0 = vcmask 64512   ;;  %v1450_v0 = vmov 0   ;;  %s2269_s2 = inlined_call_operand.vmem [shape: f32[256,1], index: 2, kind: input, shape index: {}]   ;;  %s2270_s0 = inlined_call_operand.vmem [shape: f32[8,128], index: 0, kind: input, shape index: {}]   ;;  %s2271_s1 = inlined_call_operand.vmem [shape: f32[256,8], index: 1, kind: input, shape index: {}]   ;;  %s2272_s4 = inlined_call_operand.vmem [shape: f32[256,1], index: 4, kind: input, shape index: {}]   ;;  %s2273_s6 = inlined_call_operand.vmem [shape: f32[8,1], index: 6, kind: input, shape index: {}]   ;;  %s2274_s3 = inlined_call_operand.vmem [shape: f32[256,256], index: 3, kind: input, shape index: {}]   ;;  %s2275_s5 = inlined_call_operand.vmem [shape: f32[8,256], index: 5, kind: input, shape index: {}]   ;;  %s2276_s7 = inlined_call_operand.vmem [shape: f32[8,128], index: 7, kind: output, shape index: {}]  }
   0x1   :  { %1443 = vset.pattern.permute.xlu1 %v1450_v0  ;;  %1442 = vset.pattern.permute.xlu0 %v1450_v0  ;;  %v74_v1 = vld [vmem:[%s2269_s2 + $0x78] sm:$0xff]  ;;  %v72_v2 = vld [vmem:[%s2269_s2 + $0x68] sm:$0xff]  ;;  %v26_v3 = vld [vmem:[%s2270_s0] sm:$0xff] }
   0x2   :  { %168 = vperm.xlu0 %1442, %v74_v1   ;;  %158 = vperm.xlu1 %1443, %v72_v2   ;;  %v27_v4 = vld [vmem:[%s2271_s1] sm:$0xff]  ;;  %v28_v5 = vld [vmem:[%s2271_s1 + $0x8] sm:$0xff]  ;;  %v73_v6 = vld [vmem:[%s2269_s2 + $0x70] sm:$0xff] }
   0x3   :  { %1326 = vmatprep.subr.mxu0 %v26_v3  ;;  %1328 = vmatprep.mubr.msk.f32.mxu0 %vm251_vm0, %v27_v4  ;;  %v71_v7 = vld [vmem:[%s2269_s2 + $0x60] sm:$0xff]  ;;  %v29_v8 = vld [vmem:[%s2271_s1 + $0x10] sm:$0xff]  ;;  %v30_v9 = vld [vmem:[%s2271_s1 + $0x18] sm:$0xff] }
   0x4   :  { %1327 = vmatpush3.msra.mxu0 %v26_v3  ;;  %v70_v10 = vld [vmem:[%s2269_s2 + $0x58] sm:$0xff]  ;;  %v69_v11 = vld [vmem:[%s2269_s2 + $0x50] sm:$0xff]  ;;  %v31_v12 = vld [vmem:[%s2271_s1 + $0x20] sm:$0xff] }
   0x5   :  { %1329 = vmatmul.mubr.msk.f32.vlgmr.msra.gmra.mxu0 %vm251_vm0, %v28_v5  ;;  %v32_v13 = vld [vmem:[%s2271_s1 + $0x28] sm:$0xff]  ;;  %v67_v15 = vld [vmem:[%s2269_s2 + $0x40] sm:$0xff]  ;;  %v33_v16 = vld [vmem:[%s2271_s1 + $0x30] sm:$0xff] }
   0x6   :  { %163 = vperm.xlu0 %1442, %v73_v6   ;;  %153 = vperm.xlu1 %1443, %v71_v7   ;;  %v68_v14 = vld [vmem:[%s2269_s2 + $0x48] sm:$0xff]  ;;  %v34_v17 = vld [vmem:[%s2271_s1 + $0x38] sm:$0xff]  ;;  %v65_v19 = vld [vmem:[%s2269_s2 + $0x30] sm:$0xff] }
   0x7   :  { %1331 = vmatprep.mubr.msk.f32.mxu0 %vm251_vm0, %v29_v8  ;;  %v66_v18 = vld [vmem:[%s2269_s2 + $0x38] sm:$0xff]  ;;  %v35_v20 = vld [vmem:[%s2271_s1 + $0x40] sm:$0xff]  ;;  %v36_v21 = vld [vmem:[%s2271_s1 + $0x48] sm:$0xff] }
   0x8   :  { %v64_v22 = vld [vmem:[%s2269_s2 + $0x28] sm:$0xff]  ;;  %v63_v23 = vld [vmem:[%s2269_s2 + $0x20] sm:$0xff]  ;;  %v37_v24 = vld [vmem:[%s2271_s1 + $0x50] sm:$0xff] }
   0x9   :  { %1332 = vmatmul.mubr.msk.f32.gmra.mxu0 %vm251_vm0, %v30_v9  ;;  %v38_v25 = vld [vmem:[%s2271_s1 + $0x58] sm:$0xff]  ;;  %v61_v27 = vld [vmem:[%s2269_s2 + $0x10] sm:$0xff]  ;;  %v39_v28 = vld [vmem:[%s2271_s1 + $0x60] sm:$0xff] }
   0xa   :  { %148 = vperm.xlu0 %1442, %v70_v10   ;;  %143 = vperm.xlu1 %1443, %v69_v11   ;;  %v62_v26 = vld [vmem:[%s2269_s2 + $0x18] sm:$0xff]  ;;  %v40_v29 = vld [vmem:[%s2271_s1 + $0x68] sm:$0xff]  ;;  %v59_v31 = vld [vmem:[%s2269_s2] sm:$0xff] }
   0xb   :  { %1334 = vmatprep.mubr.msk.f32.mxu0 %vm251_vm0, %v31_v12  ;;  %v60_v30 = vld [vmem:[%s2269_s2 + $0x8] sm:$0xff]  ;;  %v41_v32 = vld [vmem:[%s2271_s1 + $0x70] sm:$0xff]  ;;  %v42_v33 = vld [vmem:[%s2271_s1 + $0x78] sm:$0xff] }
   0xc   :  { %v90_v34 = vld [vmem:[%s2269_s2 + $0xf8] sm:$0xff]  ;;  %v89_v35 = vld [vmem:[%s2269_s2 + $0xf0] sm:$0xff]  ;;  %v43_v36 = vld [vmem:[%s2271_s1 + $0x80] sm:$0xff] }
   0xd   :  { %1335 = vmatmul.mubr.msk.f32.gmra.mxu0 %vm251_vm0, %v32_v13  ;;  %v44_v37 = vld [vmem:[%s2271_s1 + $0x88] sm:$0xff]  ;;  %v87_v39 = vld [vmem:[%s2269_s2 + $0xe0] sm:$0xff]  ;;  %v45_v40 = vld [vmem:[%s2271_s1 + $0x90] sm:$0xff] }
   0xe   :  { %138 = vperm.xlu0 %1442, %v68_v14   ;;  %133 = vperm.xlu1 %1443, %v67_v15   ;;  %v88_v38 = vld [vmem:[%s2269_s2 + $0xe8] sm:$0xff]  ;;  %v46_v41 = vld [vmem:[%s2271_s1 + $0x98] sm:$0xff]  ;;  %v85_v43 = vld [vmem:[%s2269_s2 + $0xd0] sm:$0xff] }
   0xf   :  { %1337 = vmatprep.mubr.msk.f32.mxu0 %vm251_vm0, %v33_v16  ;;  %v86_v42 = vld [vmem:[%s2269_s2 + $0xd8] sm:$0xff]  ;;  %v47_v44 = vld [vmem:[%s2271_s1 + $0xa0] sm:$0xff]  ;;  %v48_v45 = vld [vmem:[%s2271_s1 + $0xa8] sm:$0xff] }
  0x10   :  { %v84_v46 = vld [vmem:[%s2269_s2 + $0xc8] sm:$0xff]  ;;  %v83_v47 = vld [vmem:[%s2269_s2 + $0xc0] sm:$0xff]  ;;  %v49_v48 = vld [vmem:[%s2271_s1 + $0xb0] sm:$0xff] }
  0x11   :  { %1338 = vmatmul.mubr.msk.f32.gmra.mxu0 %vm251_vm0, %v34_v17  ;;  %v50_v49 = vld [vmem:[%s2271_s1 + $0xb8] sm:$0xff]  ;;  %v81_v51 = vld [vmem:[%s2269_s2 + $0xb0] sm:$0xff]  ;;  %v51_v52 = vld [vmem:[%s2271_s1 + $0xc0] sm:$0xff] }
  0x12   :  { %128 = vperm.xlu0 %1442, %v66_v18   ;;  %123 = vperm.xlu1 %1443, %v65_v19   ;;  %v82_v50 = vld [vmem:[%s2269_s2 + $0xb8] sm:$0xff]  ;;  %v52_v53 = vld [vmem:[%s2271_s1 + $0xc8] sm:$0xff]  ;;  %v79_v55 = vld [vmem:[%s2269_s2 + $0xa0] sm:$0xff] }
  0x13   :  { %1340 = vmatprep.mubr.msk.f32.mxu0 %vm251_vm0, %v35_v20  ;;  %v80_v54 = vld [vmem:[%s2269_s2 + $0xa8] sm:$0xff]  ;;  %v53_v56 = vld [vmem:[%s2271_s1 + $0xd0] sm:$0xff]  ;;  %v54_v57 = vld [vmem:[%s2271_s1 + $0xd8] sm:$0xff] }
  0x14   :  { %v78_v58 = vld [vmem:[%s2269_s2 + $0x98] sm:$0xff]  ;;  %v77_v59 = vld [vmem:[%s2269_s2 + $0x90] sm:$0xff]  ;;  %v55_v60 = vld [vmem:[%s2271_s1 + $0xe0] sm:$0xff] }
  0x15   :  { %1341 = vmatmul.mubr.msk.f32.gmra.mxu0 %vm251_vm0, %v36_v21  ;;  %v56_v61 = vld [vmem:[%s2271_s1 + $0xe8] sm:$0xff]  ;;  %v75_v63 = vld [vmem:[%s2269_s2 + $0x80] sm:$0xff]  ;;  %v57_v0 = vld [vmem:[%s2271_s1 + $0xf0] sm:$0xff] }
  0x16   :  { %118 = vperm.xlu0 %1442, %v64_v22   ;;  %113 = vperm.xlu1 %1443, %v63_v23   ;;  %v76_v62 = vld [vmem:[%s2269_s2 + $0x88] sm:$0xff]  ;;  %v58_v1 = vld [vmem:[%s2271_s1 + $0xf8] sm:$0xff]  ;;  %v699_v4 = vld [vmem:[%s2272_s4 + $0xf0] sm:$0xff]  ;;  %v1451_v22 = vmov 0.0  }
  0x17   :  { %1343 = vmatprep.mubr.msk.f32.mxu0 %vm251_vm0, %v37_v24  ;;  %v700_v2 = vld [vmem:[%s2272_s4 + $0xf8] sm:$0xff]  ;;  %v683_v5 = vld [vmem:[%s2272_s4 + $0x70] sm:$0xff]  ;;  %v698_v6 = vld [vmem:[%s2272_s4 + $0xe8] sm:$0xff]  ;;  %861 = vmatprep.subr.mxu0 %v1451_v22 }
  0x18   :  { %v684_v3 = vld [vmem:[%s2272_s4 + $0x78] sm:$0xff]  ;;  %v682_v7 = vld [vmem:[%s2272_s4 + $0x68] sm:$0xff]  ;;  %v697_v8 = vld [vmem:[%s2272_s4 + $0xe0] sm:$0xff]  ;;  %1376 = vmatprep.subr.mxu1 %v1451_v22 }
  0x19   :  { %1344 = vmatmul.mubr.msk.f32.gmra.mxu0 %vm251_vm0, %v38_v25  ;;  %v681_v9 = vld [vmem:[%s2272_s4 + $0x60] sm:$0xff]  ;;  %v696_v10 = vld [vmem:[%s2272_s4 + $0xd8] sm:$0xff]  ;;  %v695_v12 = vld [vmem:[%s2272_s4 + $0xd0] sm:$0xff] }
  0x1a   :  { %108 = vperm.xlu0 %1442, %v62_v26   ;;  %103 = vperm.xlu1 %1443, %v61_v27   ;;  %v680_v11 = vld [vmem:[%s2272_s4 + $0x58] sm:$0xff]  ;;  %v679_v13 = vld [vmem:[%s2272_s4 + $0x50] sm:$0xff]  ;;  %v694_v14 = vld [vmem:[%s2272_s4 + $0xc8] sm:$0xff] }
  0x1b   :  { %1346 = vmatprep.mubr.msk.f32.mxu0 %vm251_vm0, %v39_v28  ;;  %v678_v15 = vld [vmem:[%s2272_s4 + $0x48] sm:$0xff]  ;;  %v693_v16 = vld [vmem:[%s2272_s4 + $0xc0] sm:$0xff]  ;;  %v692_v18 = vld [vmem:[%s2272_s4 + $0xb8] sm:$0xff] }
  0x1c   :  { %v677_v17 = vld [vmem:[%s2272_s4 + $0x40] sm:$0xff]  ;;  %v676_v19 = vld [vmem:[%s2272_s4 + $0x38] sm:$0xff]  ;;  %v691_v20 = vld [vmem:[%s2272_s4 + $0xb0] sm:$0xff] }
  0x1d   :  { %1347 = vmatmul.mubr.msk.f32.gmra.mxu0 %vm251_vm0, %v40_v29  ;;  %v675_v21 = vld [vmem:[%s2272_s4 + $0x30] sm:$0xff]  ;;  %v690_v23 = vld [vmem:[%s2272_s4 + $0xa8] sm:$0xff]  ;;  %v689_v25 = vld [vmem:[%s2272_s4 + $0xa0] sm:$0xff] }
  0x1e   :  { %98 = vperm.xlu0 %1442, %v60_v30   ;;  %93 = vperm.xlu1 %1443, %v59_v31   ;;  %v674_v24 = vld [vmem:[%s2272_s4 + $0x28] sm:$0xff]  ;;  %v673_v26 = vld [vmem:[%s2272_s4 + $0x20] sm:$0xff]  ;;  %v688_v27 = vld [vmem:[%s2272_s4 + $0x98] sm:$0xff] }
  0x1f   :  { %1349 = vmatprep.mubr.msk.f32.mxu0 %vm251_vm0, %v41_v32  ;;  %v672_v28 = vld [vmem:[%s2272_s4 + $0x18] sm:$0xff]  ;;  %v687_v29 = vld [vmem:[%s2272_s4 + $0x90] sm:$0xff]  ;;  %v686_v31 = vld [vmem:[%s2272_s4 + $0x88] sm:$0xff] }
  0x20   :  { %v671_v30 = vld [vmem:[%s2272_s4 + $0x10] sm:$0xff]  ;;  %v670_v32 = vld [vmem:[%s2272_s4 + $0x8] sm:$0xff] }
  0x21   :  { %1350 = vmatmul.mubr.msk.f32.gmra.mxu0 %vm251_vm0, %v42_v33  ;;  %v685_v33 = vld [vmem:[%s2272_s4 + $0x80] sm:$0xff] }
  0x22   :  { %248 = vperm.xlu0 %1442, %v90_v34   ;;  %243 = vperm.xlu1 %1443, %v89_v35   ;;  %v669_v34 = vld [vmem:[%s2272_s4] sm:$0xff] }
  0x23   :  { %1352 = vmatprep.mubr.msk.f32.mxu0 %vm251_vm0, %v43_v36  ;;  %v1120_v35 = vld [vmem:[%s2273_s6] sm:$0xff]  ;;  %v606_v36 = vld [vmem:[%s2274_s3 + $0x8] sm:$0xff] }
  0x25   :  { %1353 = vmatmul.mubr.msk.f32.gmra.mxu0 %vm251_vm0, %v44_v37  ;;  %v636_v37 = vld [vmem:[%s2274_s3 + $0xf8] sm:$0xff] }
  0x26   :  { %238 = vperm.xlu0 %1442, %v88_v38   ;;  %233 = vperm.xlu1 %1443, %v87_v39  }
  0x27   :  { %1355 = vmatprep.mubr.msk.f32.mxu0 %vm251_vm0, %v45_v40  ;;  %1000 = vmatprep.mubr.f32.mxu1 %v636_v37 }
  0x29   :  { %1356 = vmatmul.mubr.msk.f32.gmra.mxu0 %vm251_vm0, %v46_v41 }
  0x2a   :  { %228 = vperm.xlu0 %1442, %v86_v42   ;;  %223 = vperm.xlu1 %1443, %v85_v43  }
  0x2b   :  { %1358 = vmatprep.mubr.msk.f32.mxu0 %vm251_vm0, %v47_v44 }
  0x2d   :  { %1359 = vmatmul.mubr.msk.f32.gmra.mxu0 %vm251_vm0, %v48_v45 }
  0x2e   :  { %218 = vperm.xlu0 %1442, %v84_v46   ;;  %213 = vperm.xlu1 %1443, %v83_v47  }
  0x2f   :  { %1361 = vmatprep.mubr.msk.f32.mxu0 %vm251_vm0, %v49_v48 }
  0x31   :  { %1362 = vmatmul.mubr.msk.f32.gmra.mxu0 %vm251_vm0, %v50_v49 }
  0x32   :  { %208 = vperm.xlu0 %1442, %v82_v50   ;;  %203 = vperm.xlu1 %1443, %v81_v51  }
  0x33   :  { %1364 = vmatprep.mubr.msk.f32.mxu0 %vm251_vm0, %v51_v52 }
  0x35   :  { %1365 = vmatmul.mubr.msk.f32.gmra.mxu0 %vm251_vm0, %v52_v53 }
  0x36   :  { %198 = vperm.xlu0 %1442, %v80_v54   ;;  %193 = vperm.xlu1 %1443, %v79_v55  }
  0x37   :  { %1367 = vmatprep.mubr.msk.f32.mxu0 %vm251_vm0, %v53_v56 }
  0x39   :  { %1368 = vmatmul.mubr.msk.f32.gmra.mxu0 %vm251_vm0, %v54_v57 }
  0x3a   :  { %188 = vperm.xlu0 %1442, %v78_v58   ;;  %183 = vperm.xlu1 %1443, %v77_v59  }
  0x3b   :  { %1370 = vmatprep.mubr.msk.f32.mxu0 %vm251_vm0, %v55_v60 }
  0x3d   :  { %1371 = vmatmul.mubr.msk.f32.gmra.mxu0 %vm251_vm0, %v56_v61 }
  0x3e   :  { %178 = vperm.xlu0 %1442, %v76_v62   ;;  %173 = vperm.xlu1 %1443, %v75_v63  }
  0x3f   :  { %1373 = vmatprep.mubr.msk.f32.mxu0 %vm251_vm0, %v57_v0 }
  0x41   :  { %1374 = vmatmul.mubr.msk.f32.gmra.mxu0 %vm251_vm0, %v58_v1 }
  0x42   :  { %858 = vperm.xlu0 %1442, %v700_v2   ;;  %778 = vperm.xlu1 %1443, %v684_v3  }
  0x43   :  { %925 = vmatprep.mubr.f32.mxu0 %v606_v36 }
  0x46   :  { %853 = vperm.xlu0 %1442, %v699_v4   ;;  %773 = vperm.xlu1 %1443, %v683_v5  }
  0x4a   :  { %848 = vperm.xlu0 %1442, %v698_v6   ;;  %768 = vperm.xlu1 %1443, %v682_v7  }
  0x4e   :  { %843 = vperm.xlu0 %1442, %v697_v8   ;;  %763 = vperm.xlu1 %1443, %v681_v9  }
  0x52   :  { %838 = vperm.xlu0 %1442, %v696_v10   ;;  %758 = vperm.xlu1 %1443, %v680_v11  }
  0x56   :  { %833 = vperm.xlu0 %1442, %v695_v12   ;;  %753 = vperm.xlu1 %1443, %v679_v13  }
  0x5a   :  { %828 = vperm.xlu0 %1442, %v694_v14   ;;  %748 = vperm.xlu1 %1443, %v678_v15  }
  0x5e   :  { %823 = vperm.xlu0 %1442, %v693_v16   ;;  %743 = vperm.xlu1 %1443, %v677_v17  }
  0x62   :  { %818 = vperm.xlu0 %1442, %v692_v18   ;;  %738 = vperm.xlu1 %1443, %v676_v19  }
  0x66   :  { %813 = vperm.xlu0 %1442, %v691_v20   ;;  %733 = vperm.xlu1 %1443, %v675_v21  }
  0x6a   :  { %808 = vperm.xlu0 %1442, %v690_v23   ;;  %728 = vperm.xlu1 %1443, %v674_v24  }
  0x6e   :  { %803 = vperm.xlu0 %1442, %v689_v25   ;;  %723 = vperm.xlu1 %1443, %v673_v26  }
  0x72   :  { %798 = vperm.xlu0 %1442, %v688_v27   ;;  %718 = vperm.xlu1 %1443, %v672_v28  }
  0x76   :  { %793 = vperm.xlu0 %1442, %v687_v29   ;;  %713 = vperm.xlu1 %1443, %v671_v30  }
  0x7a   :  { %788 = vperm.xlu0 %1442, %v686_v31   ;;  %708 = vperm.xlu1 %1443, %v670_v32  }
  0x7d   :  { %v169_v38 = vpop.permute.xlu0 %168  ;;  %v159_v39 = vpop.permute.xlu1 %158 }
  0x7e   :  { %783 = vperm.xlu0 %1442, %v685_v33   ;;  %703 = vperm.xlu1 %1443, %v669_v34  }
  0x81   :  { %v164_v41 = vpop.permute.xlu0 %163  ;;  %v154_v43 = vpop.permute.xlu1 %153 }
  0x82   :  { %1123 = vperm.xlu0 %1442, %v1120_v35  }
  0x85   :  { %v149_v46 = vpop.permute.xlu0 %148  ;;  %v144_v48 = vpop.permute.xlu1 %143 }
  0x89   :  { %v139_v51 = vpop.permute.xlu0 %138  ;;  %v134_v53 = vpop.permute.xlu1 %133 }
  0x8d   :  { %v129_v56 = vpop.permute.xlu0 %128  ;;  %v124_v58 = vpop.permute.xlu1 %123 }
  0x91   :  { %v1840_v61 = vpop.permute.xlu0 %118  ;;  %v1842_v63 = vpop.permute.xlu1 %113 }
  0x95   :  { %v1844_v6 = vpop.permute.xlu0 %108  ;;  %v1848_v10 = vpop.permute.xlu1 %103 }
  0x99   :  { %v1858_v17 = vpop.permute.xlu0 %98  ;;  %v1864_v21 = vpop.permute.xlu1 %93 }
  0x9d   :  { %v1874_v29 = vpop.permute.xlu0 %248  ;;  %v1881_v33 = vpop.permute.xlu1 %243 }
  0xc5   :  { %v1826_v40 = vpop.f32.mrf.mxu0 }
  0xc7   :  { %v1828_v42 = vpop.f32.mrf.mxu0 }
  0xc9   :  { %v1830_v44 = vpop.f32.mrf.mxu0 }
  0xcb   :  { %v1832_v45 = vpop.f32.mrf.mxu0 }
  0xcd   :  { %v1834_v47 = vpop.f32.mrf.mxu0 }
  0xce   :  { %v440_v35 = vadd.f32 %v1834_v47, %v1840_v61 }
  0xcf   :  { %v1836_v49 = vpop.f32.mrf.mxu0 }
  0xd0   :  { %v578_v47 = vmax.f32 %v440_v35, 0.0 }
  0xd1   :  { %v1339_v50 = vpop.f32.mrf.mxu0 }
  0xd2   :  { %v450_v27 = vadd.f32 %v1339_v50, %v129_v56 }
  0xd3   :  { %v1838_v52 = vpop.f32.mrf.mxu0 }
  0xd4   :  { %v445_v31 = vadd.f32 %v1838_v52, %v124_v58  ;;  %v580_v36 = vmax.f32 %v450_v27, 0.0 }
  0xd5   :  { %v1342_v54 = vpop.f32.mrf.mxu0 }
  0xd6   :  { %v460_v19 = vadd.f32 %v1342_v54, %v139_v51 }
  0xd7   :  { %v454_v55 = vpop.f32.mrf.mxu0 }
  0xd8   :  { %v455_v24 = vadd.f32 %v454_v55, %v134_v53  ;;  %v582_v28 = vmax.f32 %v460_v19, 0.0 }
  0xd9   :  { %v1345_v57 = vpop.f32.mrf.mxu0 }
  0xda   :  { %v470_v12 = vadd.f32 %v1345_v57, %v149_v46  ;;  %v581_v32 = vmax.f32 %v455_v24, 0.0  ;;  %v430_v46 = vadd.f32 %v1830_v44, %v1844_v6  ;;  %v420_v44 = vadd.f32 %v1826_v40, %v1858_v17 }
  0xdb   :  { %v464_v59 = vpop.f32.mrf.mxu0 }
  0xdc   :  { %v465_v15 = vadd.f32 %v464_v59, %v144_v48  ;;  %v584_v20 = vmax.f32 %v470_v12, 0.0  ;;  %v234_v48 = vpop.permute.xlu1 %233  ;;  %v576_v53 = vmax.f32 %v430_v46, 0.0  ;;  %v574_v40 = vmax.f32 %v420_v44, 0.0  ;;  %v608_v46 = vld [vmem:[%s2274_s3 + $0x18] sm:$0xff] }
  0xdd   :  { %v1348_v60 = vpop.f32.mrf.mxu0  ;;  %v612_v44 = vld [vmem:[%s2274_s3 + $0x38] sm:$0xff] }
  0xde   :  { %v480_v3 = vadd.f32 %v1348_v60, %v159_v39  ;;  %v583_v25 = vmax.f32 %v465_v15, 0.0  ;;  %v579_v39 = vmax.f32 %v445_v31, 0.0 }
  0xdf   :  { %v474_v62 = vpop.f32.mrf.mxu0 }
  0xe0   :  { %v475_v8 = vadd.f32 %v474_v62, %v154_v43  ;;  %v586_v13 = vmax.f32 %v480_v3, 0.0  ;;  %v224_v57 = vpop.permute.xlu1 %223 }
  0xe1   :  { %v1351_v0 = vpop.f32.mrf.mxu0 }
  0xe2   :  { %v490_v1 = vadd.f32 %v1351_v0, %v169_v38  ;;  %v585_v16 = vmax.f32 %v475_v8, 0.0  ;;  %v435_v38 = vadd.f32 %v1836_v49, %v1842_v63  ;;  %v425_v49 = vadd.f32 %v1832_v45, %v1848_v10 }
  0xe3   :  { %v484_v2 = vpop.f32.mrf.mxu0  ;;  %v415_v45 = vadd.f32 %v1828_v42, %v1864_v21 }
  0xe4   :  { %v588_v4 = vmax.f32 %v490_v1, 0.0  ;;  %v485_v5 = vadd.f32 %v484_v2, %v164_v41  ;;  %v239_v41 = vpop.permute.xlu0 %238  ;;  %v577_v51 = vmax.f32 %v435_v38, 0.0  ;;  %v575_v56 = vmax.f32 %v425_v49, 0.0  ;;  %v214_v2 = vpop.permute.xlu1 %213  ;;  %v640_v49 = vld [vmem:[%s2274_s3 + $0x118] sm:$0xff] }
  0xe5   :  { %v1846_v7 = vpop.f32.mrf.mxu0  ;;  %v573_v60 = vmax.f32 %v415_v45, 0.0  ;;  %v614_v45 = vld [vmem:[%s2274_s3 + $0x48] sm:$0xff] }
  0xe6   :  { %v587_v9 = vmax.f32 %v485_v5, 0.0  ;;  %862 = vmatpush1.msra.mxu0 %v588_v4  ;;  %1408 = vmatpush1.msra.mxu1 %v588_v4 }
  0xe7   :  { %v1850_v11 = vpop.f32.mrf.mxu0  ;;  %863 = vmatprep.subr.mxu0 %v1451_v22  ;;  %1377 = vmatprep.subr.mxu1 %v1451_v22 }
  0xe8   :  { %864 = vmatpush1.msra.mxu0 %v587_v9  ;;  %1409 = vmatpush1.msra.mxu1 %v587_v9  ;;  %v229_v54 = vpop.permute.xlu0 %228  ;;  %v204_v12 = vpop.permute.xlu1 %203 }
  0xe9   :  { %v1854_v14 = vpop.f32.mrf.mxu0  ;;  %865 = vmatprep.subr.mxu0 %v1451_v22  ;;  %1378 = vmatprep.subr.mxu1 %v1451_v22 }
  0xea   :  { %866 = vmatpush1.msra.mxu0 %v586_v13  ;;  %1410 = vmatpush1.msra.mxu1 %v586_v13 }
  0xeb   :  { %v1860_v18 = vpop.f32.mrf.mxu0  ;;  %867 = vmatprep.subr.mxu0 %v1451_v22  ;;  %1379 = vmatprep.subr.mxu1 %v1451_v22 }
  0xec   :  { %868 = vmatpush1.msra.mxu0 %v585_v16  ;;  %1411 = vmatpush1.msra.mxu1 %v585_v16  ;;  %v219_v61 = vpop.permute.xlu0 %218  ;;  %v194_v24 = vpop.permute.xlu1 %193 }
  0xed   :  { %v1866_v23 = vpop.f32.mrf.mxu0  ;;  %869 = vmatprep.subr.mxu0 %v1451_v22  ;;  %1380 = vmatprep.subr.mxu1 %v1451_v22 }
  0xee   :  { %870 = vmatpush1.msra.mxu0 %v584_v20  ;;  %1412 = vmatpush1.msra.mxu1 %v584_v20 }
  0xef   :  { %v1870_v26 = vpop.f32.mrf.mxu0  ;;  %871 = vmatprep.subr.mxu0 %v1451_v22  ;;  %1381 = vmatprep.subr.mxu1 %v1451_v22 }
  0xf0   :  { %872 = vmatpush1.msra.mxu0 %v583_v25  ;;  %1413 = vmatpush1.msra.mxu1 %v583_v25  ;;  %v209_v8 = vpop.permute.xlu0 %208  ;;  %v515_v31 = vadd.f32 %v1870_v26, %v194_v24  ;;  %v658_v24 = vld [vmem:[%s2274_s3 + $0x1a8] sm:$0xff] }
  0xf1   :  { %v1876_v30 = vpop.f32.mrf.mxu0  ;;  %873 = vmatprep.subr.mxu0 %v1451_v22  ;;  %1382 = vmatprep.subr.mxu1 %v1451_v22 }
  0xf2   :  { %874 = vmatpush1.msra.mxu0 %v582_v28  ;;  %1414 = vmatpush1.msra.mxu1 %v582_v28  ;;  %v530_v20 = vadd.f32 %v1876_v30, %v209_v8  ;;  %v593_v26 = vmax.f32 %v515_v31, 0.0  ;;  %v621_v8 = vld [vmem:[%s2274_s3 + $0x80] sm:$0xff]  ;;  %v659_v31 = vld [vmem:[%s2274_s3 + $0x1b0] sm:$0xff] }
  0xf3   :  { %v1883_v34 = vpop.f32.mrf.mxu0  ;;  %875 = vmatprep.subr.mxu0 %v1451_v22  ;;  %1383 = vmatprep.subr.mxu1 %v1451_v22 }
  0xf4   :  { %876 = vmatpush1.msra.mxu0 %v581_v32  ;;  %1415 = vmatpush1.msra.mxu1 %v581_v32  ;;  %v199_v19 = vpop.permute.xlu0 %198  ;;  %v525_v25 = vadd.f32 %v1883_v34, %v204_v12  ;;  %v654_v12 = vld [vmem:[%s2274_s3 + $0x188] sm:$0xff] }
  0xf5   :  { %v1889_v37 = vpop.f32.mrf.mxu0  ;;  %877 = vmatprep.subr.mxu0 %v1451_v22  ;;  %1384 = vmatprep.subr.mxu1 %v1451_v22  ;;  %v520_v28 = vadd.f32 %v1866_v23, %v199_v19  ;;  %v625_v19 = vld [vmem:[%s2274_s3 + $0xa0] sm:$0xff] }
  0xf6   :  { %878 = vmatpush1.msra.mxu0 %v580_v36  ;;  %1416 = vmatpush1.msra.mxu1 %v580_v36  ;;  %v540_v13 = vadd.f32 %v1889_v37, %v219_v61  ;;  %v595_v32 = vmax.f32 %v525_v25, 0.0  ;;  %v618_v61 = vld [vmem:[%s2274_s3 + $0x68] sm:$0xff]  ;;  %v627_v25 = vld [vmem:[%s2274_s3 + $0xb0] sm:$0xff] }
  0xf7   :  { %v1895_v43 = vpop.f32.mrf.mxu0  ;;  %879 = vmatprep.subr.mxu0 %v1451_v22  ;;  %1385 = vmatprep.subr.mxu1 %v1451_v22  ;;  %v594_v34 = vmax.f32 %v520_v28, 0.0  ;;  %v630_v28 = vld [vmem:[%s2274_s3 + $0xc8] sm:$0xff] }
  0xf8   :  { %880 = vmatpush1.msra.mxu0 %v579_v39  ;;  %1417 = vmatpush1.msra.mxu1 %v579_v39  ;;  %v535_v16 = vadd.f32 %v1895_v43, %v214_v2  ;;  %v598_v21 = vmax.f32 %v540_v13, 0.0  ;;  %v189_v30 = vpop.permute.xlu0 %188  ;;  %v635_v43 = vld [vmem:[%s2274_s3 + $0xf0] sm:$0xff]  ;;  %v650_v2 = vld [vmem:[%s2274_s3 + $0x168] sm:$0xff] }
  0xf9   :  { %v1369_v50 = vpop.f32.mrf.mxu0  ;;  %881 = vmatprep.subr.mxu0 %v1451_v22  ;;  %1386 = vmatprep.subr.mxu1 %v1451_v22  ;;  %v510_v23 = vadd.f32 %v1854_v14, %v189_v30  ;;  %v623_v13 = vld [vmem:[%s2274_s3 + $0x90] sm:$0xff]  ;;  %v629_v30 = vld [vmem:[%s2274_s3 + $0xc0] sm:$0xff] }
  0xfa   :  { %882 = vmatpush1.msra.mxu0 %v578_v47  ;;  %1418 = vmatpush1.msra.mxu1 %v578_v47  ;;  %v550_v5 = vadd.f32 %v1369_v50, %v229_v54  ;;  %v597_v27 = vmax.f32 %v535_v16, 0.0  ;;  %v638_v47 = vld [vmem:[%s2274_s3 + $0x108] sm:$0xff]  ;;  %v611_v54 = vld [vmem:[%s2274_s3 + $0x30] sm:$0xff] }
  0xfb   :  { %v544_v52 = vpop.f32.mrf.mxu0  ;;  %883 = vmatprep.subr.mxu0 %v1451_v22  ;;  %1387 = vmatprep.subr.mxu1 %v1451_v22  ;;  %v592_v14 = vmax.f32 %v510_v23, 0.0  ;;  %v610_v50 = vld [vmem:[%s2274_s3 + $0x28] sm:$0xff]  ;;  %v631_v23 = vld [vmem:[%s2274_s3 + $0xd0] sm:$0xff] }
  0xfc   :  { %884 = vmatpush1.msra.mxu0 %v577_v51  ;;  %1419 = vmatpush1.msra.mxu1 %v577_v51  ;;  %v545_v9 = vadd.f32 %v544_v52, %v224_v57  ;;  %v600_v15 = vmax.f32 %v550_v5, 0.0  ;;  %v179_v36 = vpop.permute.xlu0 %178  ;;  %v609_v51 = vld [vmem:[%s2274_s3 + $0x20] sm:$0xff]  ;;  %v639_v52 = vld [vmem:[%s2274_s3 + $0x110] sm:$0xff]  ;;  %v622_v5 = vld [vmem:[%s2274_s3 + $0x88] sm:$0xff] }
  0xfd   :  { %v1372_v55 = vpop.f32.mrf.mxu0  ;;  %885 = vmatprep.subr.mxu0 %v1451_v22  ;;  %1388 = vmatprep.subr.mxu1 %v1451_v22  ;;  %v500_v37 = vadd.f32 %v1846_v7, %v179_v36  ;;  %v613_v57 = vld [vmem:[%s2274_s3 + $0x40] sm:$0xff]  ;;  %v626_v16 = vld [vmem:[%s2274_s3 + $0xa8] sm:$0xff] }
  0xfe   :  { %886 = vmatpush1.msra.mxu0 %v576_v53  ;;  %1420 = vmatpush1.msra.mxu1 %v576_v53  ;;  %v560_v63 = vadd.f32 %v1372_v55, %v239_v41  ;;  %v599_v17 = vmax.f32 %v545_v9, 0.0  ;;  %v642_v53 = vld [vmem:[%s2274_s3 + $0x128] sm:$0xff]  ;;  %v641_v55 = vld [vmem:[%s2274_s3 + $0x120] sm:$0xff]  ;;  %v651_v9 = vld [vmem:[%s2274_s3 + $0x170] sm:$0xff] }
  0xff   :  { %v554_v58 = vpop.f32.mrf.mxu0  ;;  %887 = vmatprep.subr.mxu0 %v1451_v22  ;;  %1389 = vmatprep.subr.mxu1 %v1451_v22  ;;  %v590_v41 = vmax.f32 %v500_v37, 0.0  ;;  %v633_v36 = vld [vmem:[%s2274_s3 + $0xe0] sm:$0xff]  ;;  %v663_v37 = vld [vmem:[%s2274_s3 + $0x1d0] sm:$0xff] }
 0x100   :  { %888 = vmatpush1.msra.mxu0 %v575_v56  ;;  %1421 = vmatpush1.msra.mxu1 %v575_v56  ;;  %v555_v3 = vadd.f32 %v554_v58, %v234_v48  ;;  %v602_v6 = vmax.f32 %v560_v63, 0.0  ;;  %v607_v48 = vld [vmem:[%s2274_s3 + $0x10] sm:$0xff]  ;;  %v644_v56 = vld [vmem:[%s2274_s3 + $0x138] sm:$0xff]  ;;  %v617_v63 = vld [vmem:[%s2274_s3 + $0x60] sm:$0xff] }
 0x101   :  { %v1375_v59 = vpop.f32.mrf.mxu0  ;;  %889 = vmatprep.subr.mxu0 %v1451_v22  ;;  %1390 = vmatprep.subr.mxu1 %v1451_v22  ;;  %v643_v58 = vld [vmem:[%s2274_s3 + $0x130] sm:$0xff] }
 0x102   :  { %v570_v42 = vadd.f32 %v1375_v59, %v1874_v29  ;;  %890 = vmatpush1.msra.mxu0 %v574_v40  ;;  %1422 = vmatpush1.msra.mxu1 %v574_v40  ;;  %v601_v10 = vmax.f32 %v555_v3, 0.0  ;;  %v596_v29 = vmax.f32 %v530_v20, 0.0  ;;  %v616_v40 = vld [vmem:[%s2274_s3 + $0x58] sm:$0xff]  ;;  %v646_v59 = vld [vmem:[%s2274_s3 + $0x148] sm:$0xff]  ;;  %v619_v3 = vld [vmem:[%s2274_s3 + $0x70] sm:$0xff] }
 0x103   :  { %v564_v62 = vpop.f32.mrf.mxu0  ;;  %891 = vmatprep.subr.mxu0 %v1451_v22  ;;  %1391 = vmatprep.subr.mxu1 %v1451_v22  ;;  %v655_v20 = vld [vmem:[%s2274_s3 + $0x190] sm:$0xff] }
 0x104   :  { %v604_v0 = vmax.f32 %v570_v42, 0.0  ;;  %v565_v1 = vadd.f32 %v564_v62, %v1881_v33  ;;  %892 = vmatpush1.msra.mxu0 %v573_v60  ;;  %1423 = vmatpush1.msra.mxu1 %v573_v60  ;;  %v184_v33 = vpop.permute.xlu1 %183  ;;  %v615_v60 = vld [vmem:[%s2274_s3 + $0x50] sm:$0xff]  ;;  %v645_v42 = vld [vmem:[%s2274_s3 + $0x140] sm:$0xff]  ;;  %v648_v62 = vld [vmem:[%s2274_s3 + $0x158] sm:$0xff] }
 0x105   :  { %893 = vmatprep.subr.mxu0 %v1451_v22  ;;  %1392 = vmatprep.subr.mxu1 %v1451_v22  ;;  %v505_v35 = vadd.f32 %v1860_v18, %v184_v33  ;;  %v662_v33 = vld [vmem:[%s2274_s3 + $0x1c8] sm:$0xff] }
 0x106   :  { %v603_v4 = vmax.f32 %v565_v1, 0.0  ;;  %894 = vmatpush2.msra.mxu0 %v604_v0  ;;  %1424 = vmatpush2.msra.mxu1 %v604_v0  ;;  %v647_v0 = vld [vmem:[%s2274_s3 + $0x150] sm:$0xff]  ;;  %v620_v1 = vld [vmem:[%s2274_s3 + $0x78] sm:$0xff] }
 0x107   :  { %895 = vmatprep.subr.mxu0 %v1451_v22  ;;  %1393 = vmatprep.subr.mxu1 %v1451_v22  ;;  %v591_v39 = vmax.f32 %v505_v35, 0.0  ;;  %v634_v35 = vld [vmem:[%s2274_s3 + $0xe8] sm:$0xff] }
 0x108   :  { %896 = vmatpush2.msra.mxu0 %v603_v4  ;;  %1425 = vmatpush2.msra.mxu1 %v603_v4  ;;  %v174_v38 = vpop.permute.xlu1 %173  ;;  %v649_v4 = vld [vmem:[%s2274_s3 + $0x160] sm:$0xff] }
 0x109   :  { %897 = vmatprep.subr.mxu0 %v1451_v22  ;;  %1394 = vmatprep.subr.mxu1 %v1451_v22  ;;  %v495_v18 = vadd.f32 %v1850_v11, %v174_v38  ;;  %v605_v11 = vld [vmem:[%s2274_s3] sm:$0xff] }
 0x10a   :  { %898 = vmatpush2.msra.mxu0 %v602_v6  ;;  %1426 = vmatpush2.msra.mxu1 %v602_v6  ;;  %v652_v6 = vld [vmem:[%s2274_s3 + $0x178] sm:$0xff]  ;;  %v665_v38 = vld [vmem:[%s2274_s3 + $0x1e0] sm:$0xff] }
 0x10b   :  { %899 = vmatprep.subr.mxu0 %v1451_v22  ;;  %1395 = vmatprep.subr.mxu1 %v1451_v22  ;;  %v589_v7 = vmax.f32 %v495_v18, 0.0  ;;  %v668_v18 = vld [vmem:[%s2274_s3 + $0x1f8] sm:$0xff] }
 0x10c   :  { %900 = vmatpush2.msra.mxu0 %v601_v10  ;;  %1427 = vmatpush2.msra.mxu1 %v601_v10  ;;  %v624_v10 = vld [vmem:[%s2274_s3 + $0x98] sm:$0xff] }
 0x10d   :  { %901 = vmatprep.subr.mxu0 %v1451_v22  ;;  %1396 = vmatprep.subr.mxu1 %v1451_v22 }
 0x10e   :  { %902 = vmatpush2.msra.mxu0 %v600_v15  ;;  %1428 = vmatpush2.msra.mxu1 %v600_v15  ;;  %v653_v15 = vld [vmem:[%s2274_s3 + $0x180] sm:$0xff] }
 0x10f   :  { %903 = vmatprep.subr.mxu0 %v1451_v22  ;;  %1397 = vmatprep.subr.mxu1 %v1451_v22 }
 0x110   :  { %904 = vmatpush2.msra.mxu0 %v599_v17  ;;  %1429 = vmatpush2.msra.mxu1 %v599_v17  ;;  %v656_v17 = vld [vmem:[%s2274_s3 + $0x198] sm:$0xff] }
 0x111   :  { %905 = vmatprep.subr.mxu0 %v1451_v22  ;;  %1398 = vmatprep.subr.mxu1 %v1451_v22 }
 0x112   :  { %906 = vmatpush2.msra.mxu0 %v598_v21  ;;  %1430 = vmatpush2.msra.mxu1 %v598_v21  ;;  %v628_v21 = vld [vmem:[%s2274_s3 + $0xb8] sm:$0xff] }
 0x113   :  { %907 = vmatprep.subr.mxu0 %v1451_v22  ;;  %1399 = vmatprep.subr.mxu1 %v1451_v22 }
 0x114   :  { %908 = vmatpush2.msra.mxu0 %v597_v27  ;;  %1431 = vmatpush2.msra.mxu1 %v597_v27  ;;  %v657_v27 = vld [vmem:[%s2274_s3 + $0x1a0] sm:$0xff] }
 0x115   :  { %909 = vmatprep.subr.mxu0 %v1451_v22  ;;  %1400 = vmatprep.subr.mxu1 %v1451_v22 }
 0x116   :  { %910 = vmatpush2.msra.mxu0 %v596_v29  ;;  %1432 = vmatpush2.msra.mxu1 %v596_v29  ;;  %v660_v29 = vld [vmem:[%s2274_s3 + $0x1b8] sm:$0xff] }
 0x117   :  { %911 = vmatprep.subr.mxu0 %v1451_v22  ;;  %1401 = vmatprep.subr.mxu1 %v1451_v22 }
 0x118   :  { %912 = vmatpush2.msra.mxu0 %v595_v32  ;;  %1433 = vmatpush2.msra.mxu1 %v595_v32  ;;  %v632_v32 = vld [vmem:[%s2274_s3 + $0xd8] sm:$0xff] }
 0x119   :  { %913 = vmatprep.subr.mxu0 %v1451_v22  ;;  %1402 = vmatprep.subr.mxu1 %v1451_v22 }
 0x11a   :  { %914 = vmatpush2.msra.mxu0 %v594_v34  ;;  %1434 = vmatpush2.msra.mxu1 %v594_v34  ;;  %v661_v34 = vld [vmem:[%s2274_s3 + $0x1c0] sm:$0xff] }
 0x11b   :  { %915 = vmatprep.subr.mxu0 %v1451_v22  ;;  %1403 = vmatprep.subr.mxu1 %v1451_v22 }
 0x11c   :  { %916 = vmatpush2.msra.mxu0 %v593_v26  ;;  %1435 = vmatpush2.msra.mxu1 %v593_v26  ;;  %v664_v26 = vld [vmem:[%s2274_s3 + $0x1d8] sm:$0xff] }
 0x11d   :  { %917 = vmatprep.subr.mxu0 %v1451_v22  ;;  %1404 = vmatprep.subr.mxu1 %v1451_v22 }
 0x11e   :  { %918 = vmatpush2.msra.mxu0 %v592_v14  ;;  %1436 = vmatpush2.msra.mxu1 %v592_v14  ;;  %v666_v14 = vld [vmem:[%s2274_s3 + $0x1e8] sm:$0xff] }
 0x11f   :  { %919 = vmatprep.subr.mxu0 %v1451_v22  ;;  %1405 = vmatprep.subr.mxu1 %v1451_v22 }
 0x120   :  { %920 = vmatpush2.msra.mxu0 %v591_v39  ;;  %1437 = vmatpush2.msra.mxu1 %v591_v39  ;;  %v667_v39 = vld [vmem:[%s2274_s3 + $0x1f0] sm:$0xff] }
 0x121   :  { %921 = vmatprep.subr.mxu0 %v1451_v22  ;;  %1406 = vmatprep.subr.mxu1 %v1451_v22 }
 0x122   :  { %922 = vmatpush2.msra.mxu0 %v590_v41  ;;  %1438 = vmatpush2.msra.mxu1 %v590_v41  ;;  %v1119_v41 = vld [vmem:[%s2275_s5 + $0x8] sm:$0xff] }
 0x123   :  { %923 = vmatprep.subr.mxu0 %v1451_v22  ;;  %1407 = vmatprep.subr.mxu1 %v1451_v22  ;;  %v637_v22 = vld [vmem:[%s2274_s3 + $0x100] sm:$0xff] }
 0x124   :  { %924 = vmatpush2.msra.mxu0 %v589_v7  ;;  %1439 = vmatpush2.msra.mxu1 %v589_v7 }
 0x125   :  { %926 = vmatmul.mubr.f32.vlgmr.msra.gmra.mxu0 %v605_v11  ;;  %1001 = vmatmul.mubr.f32.vlgmr.msra.gmra.mxu1 %v635_v43  ;;  %v2156_v43 = vpop.permute.xlu0 %858 }
 0x126   :  { %930 = vmatprep.mubr.f32.mxu0 %v608_v46  ;;  %1005 = vmatprep.mubr.f32.mxu1 %v638_v47 }
 0x129   :  { %931 = vmatmul.mubr.f32.gmra.mxu0 %v607_v48  ;;  %1006 = vmatmul.mubr.f32.gmra.mxu1 %v637_v22  ;;  %v2158_v48 = vpop.permute.xlu1 %778 }
 0x12a   :  { %935 = vmatprep.mubr.f32.mxu0 %v610_v50  ;;  %1010 = vmatprep.mubr.f32.mxu1 %v640_v49 }
 0x12d   :  { %936 = vmatmul.mubr.f32.gmra.mxu0 %v609_v51  ;;  %1011 = vmatmul.mubr.f32.gmra.mxu1 %v639_v52  ;;  %v2164_v52 = vpop.permute.xlu0 %853 }
 0x12e   :  { %940 = vmatprep.mubr.f32.mxu0 %v612_v44  ;;  %1015 = vmatprep.mubr.f32.mxu1 %v642_v53 }
 0x131   :  { %941 = vmatmul.mubr.f32.gmra.mxu0 %v611_v54  ;;  %1016 = vmatmul.mubr.f32.gmra.mxu1 %v641_v55  ;;  %v2170_v54 = vpop.permute.xlu1 %773 }
 0x132   :  { %945 = vmatprep.mubr.f32.mxu0 %v614_v45  ;;  %1020 = vmatprep.mubr.f32.mxu1 %v644_v56 }
 0x135   :  { %946 = vmatmul.mubr.f32.gmra.mxu0 %v613_v57  ;;  %1021 = vmatmul.mubr.f32.gmra.mxu1 %v643_v58  ;;  %v2176_v58 = vpop.permute.xlu0 %848 }
 0x136   :  { %950 = vmatprep.mubr.f32.mxu0 %v616_v40  ;;  %1025 = vmatprep.mubr.f32.mxu1 %v646_v59 }
 0x139   :  { %951 = vmatmul.mubr.f32.gmra.mxu0 %v615_v60  ;;  %1026 = vmatmul.mubr.f32.gmra.mxu1 %v645_v42  ;;  %v2178_v60 = vpop.permute.xlu1 %768 }
 0x13a   :  { %955 = vmatprep.mubr.f32.mxu0 %v618_v61  ;;  %1030 = vmatprep.mubr.f32.mxu1 %v648_v62 }
 0x13d   :  { %956 = vmatmul.mubr.f32.gmra.mxu0 %v617_v63  ;;  %1031 = vmatmul.mubr.f32.gmra.mxu1 %v647_v0  ;;  %v2184_v0 = vpop.permute.xlu0 %843 }
 0x13e   :  { %960 = vmatprep.mubr.f32.mxu0 %v620_v1  ;;  %1035 = vmatprep.mubr.f32.mxu1 %v650_v2 }
 0x141   :  { %961 = vmatmul.mubr.f32.gmra.mxu0 %v619_v3  ;;  %1036 = vmatmul.mubr.f32.gmra.mxu1 %v649_v4  ;;  %v2190_v3 = vpop.permute.xlu1 %763 }
 0x142   :  { %965 = vmatprep.mubr.f32.mxu0 %v622_v5  ;;  %1040 = vmatprep.mubr.f32.mxu1 %v652_v6 }
 0x145   :  { %966 = vmatmul.mubr.f32.gmra.mxu0 %v621_v8  ;;  %1041 = vmatmul.mubr.f32.gmra.mxu1 %v651_v9  ;;  %v2196_v9 = vpop.permute.xlu0 %838 }
 0x146   :  { %970 = vmatprep.mubr.f32.mxu0 %v624_v10  ;;  %1045 = vmatprep.mubr.f32.mxu1 %v654_v12 }
 0x149   :  { %971 = vmatmul.mubr.f32.gmra.mxu0 %v623_v13  ;;  %1046 = vmatmul.mubr.f32.gmra.mxu1 %v653_v15  ;;  %v2198_v13 = vpop.permute.xlu1 %758 }
 0x14a   :  { %975 = vmatprep.mubr.f32.mxu0 %v626_v16  ;;  %1050 = vmatprep.mubr.f32.mxu1 %v656_v17 }
 0x14d   :  { %976 = vmatmul.mubr.f32.gmra.mxu0 %v625_v19  ;;  %1051 = vmatmul.mubr.f32.gmra.mxu1 %v655_v20  ;;  %v2204_v20 = vpop.permute.xlu0 %833 }
 0x14e   :  { %980 = vmatprep.mubr.f32.mxu0 %v628_v21  ;;  %1055 = vmatprep.mubr.f32.mxu1 %v658_v24 }
 0x151   :  { %981 = vmatmul.mubr.f32.gmra.mxu0 %v627_v25  ;;  %1056 = vmatmul.mubr.f32.gmra.mxu1 %v657_v27  ;;  %v2210_v25 = vpop.permute.xlu1 %753 }
 0x152   :  { %985 = vmatprep.mubr.f32.mxu0 %v630_v28  ;;  %1060 = vmatprep.mubr.f32.mxu1 %v660_v29 }
 0x155   :  { %986 = vmatmul.mubr.f32.gmra.mxu0 %v629_v30  ;;  %1061 = vmatmul.mubr.f32.gmra.mxu1 %v659_v31  ;;  %v2216_v31 = vpop.permute.xlu0 %828 }
 0x156   :  { %990 = vmatprep.mubr.f32.mxu0 %v632_v32  ;;  %1065 = vmatprep.mubr.f32.mxu1 %v662_v33 }
 0x159   :  { %991 = vmatmul.mubr.f32.gmra.mxu0 %v631_v23  ;;  %1066 = vmatmul.mubr.f32.gmra.mxu1 %v661_v34  ;;  %v2218_v23 = vpop.permute.xlu1 %748 }
 0x15a   :  { %995 = vmatprep.mubr.f32.mxu0 %v634_v35  ;;  %1070 = vmatprep.mubr.f32.mxu1 %v664_v26 }
 0x15d   :  { %996 = vmatmul.mubr.f32.gmra.mxu0 %v633_v36  ;;  %1071 = vmatmul.mubr.f32.gmra.mxu1 %v663_v37  ;;  %v2220_v37 = vpop.permute.xlu0 %823 }
 0x15e   :  { %1075 = vmatprep.mubr.f32.mxu1 %v666_v14  ;;  %1190 = vmatprep.mubr.f32.mxu0 %v1119_v41 }
 0x161   :  { %1076 = vmatmul.mubr.f32.gmra.mxu1 %v665_v38 }
 0x162   :  { %1080 = vmatprep.mubr.f32.mxu1 %v668_v18  ;;  %v2222_v18 = vpop.permute.xlu1 %743 }
 0x165   :  { %1081 = vmatmul.mubr.f32.gmra.mxu1 %v667_v39 }
 0x1e5   :  { %v2152_v7 = vpop.f32.mrf.mxu0  ;;  %v2154_v11 = vpop.f32.mrf.mxu1 }
 0x1e6   :  { %2277 = vst [vmem:[#allocation2_spill] sm:$0xff] %v2152_v7 }
 0x1e7   :  { %v929_v46 = vpop.f32.mrf.mxu0  ;;  %v1004_v47 = vpop.f32.mrf.mxu1 }
 0x1e9   :  { %v2160_v22 = vpop.f32.mrf.mxu0  ;;  %v2162_v50 = vpop.f32.mrf.mxu1 }
 0x1ea   :  { %2278 = vst [vmem:[#allocation3_spill] sm:$0xff] %v2160_v22  ;;  %2279 = vst [vmem:[#allocation4_spill] sm:$0xff] %v2162_v50 }
 0x1eb   :  { %v934_v49 = vpop.f32.mrf.mxu0  ;;  %v1009_v51 = vpop.f32.mrf.mxu1 }
 0x1ec   :  { %v819_v49 = vpop.permute.xlu0 %818 }
 0x1ed   :  { %v2166_v44 = vpop.f32.mrf.mxu0  ;;  %v2168_v53 = vpop.f32.mrf.mxu1 }
 0x1ef   :  { %v939_v55 = vpop.f32.mrf.mxu0  ;;  %v1014_v45 = vpop.f32.mrf.mxu1 }
 0x1f0   :  { %v2224_v45 = vpop.permute.xlu1 %738 }
 0x1f1   :  { %v2172_v56 = vpop.f32.mrf.mxu0  ;;  %v2174_v57 = vpop.f32.mrf.mxu1 }
 0x1f3   :  { %v944_v40 = vpop.f32.mrf.mxu0  ;;  %v1019_v59 = vpop.f32.mrf.mxu1 }
 0x1f5   :  { %v2180_v42 = vpop.f32.mrf.mxu0  ;;  %v2182_v61 = vpop.f32.mrf.mxu1 }
 0x1f7   :  { %v949_v62 = vpop.f32.mrf.mxu0  ;;  %v1024_v63 = vpop.f32.mrf.mxu1 }
 0x1f9   :  { %v2186_v1 = vpop.f32.mrf.mxu0  ;;  %v2188_v2 = vpop.f32.mrf.mxu1 }
 0x1fb   :  { %v954_v4 = vpop.f32.mrf.mxu0  ;;  %v1029_v5 = vpop.f32.mrf.mxu1 }
 0x1fc   :  { %v814_v4 = vpop.permute.xlu0 %813 }
 0x1fd   :  { %v2192_v6 = vpop.f32.mrf.mxu0  ;;  %v2194_v8 = vpop.f32.mrf.mxu1 }
 0x1ff   :  { %v959_v10 = vpop.f32.mrf.mxu0  ;;  %v1034_v12 = vpop.f32.mrf.mxu1 }
 0x200   :  { %v734_v12 = vpop.permute.xlu1 %733 }
 0x201   :  { %v2200_v15 = vpop.f32.mrf.mxu0  ;;  %v2202_v16 = vpop.f32.mrf.mxu1 }
 0x203   :  { %v964_v17 = vpop.f32.mrf.mxu0  ;;  %v1039_v19 = vpop.f32.mrf.mxu1 }
 0x205   :  { %v2206_v21 = vpop.f32.mrf.mxu0  ;;  %v2208_v24 = vpop.f32.mrf.mxu1 }
 0x207   :  { %v969_v27 = vpop.f32.mrf.mxu0  ;;  %v1044_v28 = vpop.f32.mrf.mxu1 }
 0x208   :  { %v809_v28 = vpop.permute.xlu0 %808 }
 0x209   :  { %v2212_v29 = vpop.f32.mrf.mxu0  ;;  %v2214_v30 = vpop.f32.mrf.mxu1 }
 0x20b   :  { %v974_v32 = vpop.f32.mrf.mxu0  ;;  %v1049_v33 = vpop.f32.mrf.mxu1 }
 0x20c   :  { %v729_v33 = vpop.permute.xlu1 %728 }
 0x20d   :  { %v977_v34 = vpop.f32.mrf.mxu0  ;;  %v1052_v35 = vpop.f32.mrf.mxu1 }
 0x20f   :  { %v979_v26 = vpop.f32.mrf.mxu0  ;;  %v1054_v36 = vpop.f32.mrf.mxu1 }
 0x210   :  { %v1003_v26 = vadd.f32 %v2154_v11, %v2158_v48 }
 0x211   :  { %v982_v14 = vpop.f32.mrf.mxu0  ;;  %v1057_v38 = vpop.f32.mrf.mxu1 }
 0x213   :  { %v984_v39 = vpop.f32.mrf.mxu0  ;;  %v1059_v41 = vpop.f32.mrf.mxu1 }
 0x215   :  { %v987_v46 = vpop.f32.mrf.mxu0  ;;  %v1062_v47 = vpop.f32.mrf.mxu1 }
 0x216   :  { %v988_v11 = vadd.f32 %v987_v46, %v2190_v3  ;;  %v1053_v46 = vadd.f32 %v1052_v35, %v2216_v31 }
 0x217   :  { %v989_v51 = vpop.f32.mrf.mxu0  ;;  %v1064_v55 = vpop.f32.mrf.mxu1 }
 0x218   :  { %v1111_v31 = vmax.f32 %v1053_v46, 0.0 }
 0x219   :  { %v992_v40 = vpop.f32.mrf.mxu0  ;;  %v1067_v59 = vpop.f32.mrf.mxu1 }
 0x21a   :  { %v993_v7 = vadd.f32 %v992_v40, %v2178_v60  ;;  %v1068_v50 = vadd.f32 %v1067_v59, %v2184_v0  ;;  %v978_v0 = vadd.f32 %v977_v34, %v2210_v25  ;;  %v1098_v59 = vmax.f32 %v988_v11, 0.0 }
 0x21b   :  { %v994_v62 = vpop.f32.mrf.mxu0  ;;  %v1069_v63 = vpop.f32.mrf.mxu1  ;;  %v1043_v25 = vadd.f32 %v2208_v24, %v819_v49 }
 0x21c   :  { %v1114_v60 = vmax.f32 %v1068_v50, 0.0 }
 0x21d   :  { %v997_v5 = vpop.f32.mrf.mxu0  ;;  %v1072_v10 = vpop.f32.mrf.mxu1  ;;  %v1109_v24 = vmax.f32 %v1043_v25, 0.0 }
 0x21e   :  { %v998_v51 = vadd.f32 %v997_v5, %v2170_v54  ;;  %v1073_v62 = vadd.f32 %v1072_v10, %v2176_v58  ;;  %v983_v54 = vadd.f32 %v982_v14, %v2198_v13  ;;  %v1099_v58 = vmax.f32 %v993_v7, 0.0 }
 0x21f   :  { %v1074_v17 = vpop.f32.mrf.mxu1  ;;  %v999_v19 = vpop.f32.mrf.mxu0  ;;  %v1058_v5 = vadd.f32 %v1057_v38, %v2204_v20  ;;  %v1048_v7 = vadd.f32 %v2214_v30, %v2220_v37  ;;  %v968_v13 = vadd.f32 %v2206_v21, %v2222_v18  ;;  %v1096_v20 = vmax.f32 %v978_v0, 0.0 }
 0x220   :  { %v804_v17 = vpop.permute.xlu0 %803  ;;  %v1101_v19 = vmax.f32 %v1003_v26, 0.0  ;;  %v1100_v48 = vmax.f32 %v998_v51, 0.0  ;;  %v1038_v30 = vadd.f32 %v2202_v16, %v814_v4  ;;  %v958_v14 = vadd.f32 %v2192_v6, %v734_v12 }
 0x221   :  { %v1077_v27 = vpop.f32.mrf.mxu1  ;;  %v1112_v50 = vmax.f32 %v1058_v5, 0.0  ;;  %v1110_v37 = vmax.f32 %v1048_v7, 0.0  ;;  %v1094_v21 = vmax.f32 %v968_v13, 0.0  ;;  %v1033_v38 = vadd.f32 %v2194_v8, %v809_v28 }
 0x222   :  { %v1078_v39 = vadd.f32 %v1077_v27, %v2164_v52  ;;  %v1115_v52 = vmax.f32 %v1073_v62, 0.0  ;;  %v953_v18 = vadd.f32 %v2186_v1, %v729_v33  ;;  %v1108_v49 = vmax.f32 %v1038_v30, 0.0 }
 0x223   :  { %v1079_v32 = vpop.f32.mrf.mxu1  ;;  %v1092_v4 = vmax.f32 %v958_v14, 0.0  ;;  %v1107_v27 = vmax.f32 %v1033_v38, 0.0 }
 0x224   :  { %v724_v32 = vpop.permute.xlu1 %723  ;;  %v1116_v22 = vmax.f32 %v1078_v39, 0.0  ;;  %v799_v40 = vpop.permute.xlu0 %798  ;;  %v1091_v28 = vmax.f32 %v953_v18, 0.0 }
 0x225   :  { %v1082_v36 = vpop.f32.mrf.mxu1  ;;  %v948_v16 = vadd.f32 %v2180_v42, %v724_v32  ;;  %v1023_v12 = vadd.f32 %v2182_v61, %v799_v40  ;;  %v2280_v61 = vld [vmem:[#allocation3_spill] sm:$0xff] }
 0x226   :  { %v1083_v41 = vadd.f32 %v1082_v36, %v2156_v43  ;;  %v1063_v43 = vadd.f32 %v1062_v47, %v2196_v9  ;;  %v1097_v9 = vmax.f32 %v983_v54, 0.0 }
 0x227   :  { %v1084_v55 = vpop.f32.mrf.mxu1  ;;  %v1090_v26 = vmax.f32 %v948_v16, 0.0  ;;  %v1105_v36 = vmax.f32 %v1023_v12, 0.0 }
 0x228   :  { %v1117_v63 = vmax.f32 %v1083_v41, 0.0  ;;  %v719_v3 = vpop.permute.xlu1 %718  ;;  %v1113_v10 = vmax.f32 %v1063_v43, 0.0  ;;  %v794_v34 = vpop.permute.xlu0 %793  ;;  %v2281_v55 = vld [vmem:[#allocation4_spill] sm:$0xff] }
 0x229   :  { %v943_v8 = vadd.f32 %v2172_v56, %v719_v3  ;;  %v1018_v1 = vadd.f32 %v2174_v57, %v794_v34  ;;  %v2282_v57 = vld [vmem:[#allocation2_spill] sm:$0xff] }
 0x22a   :  { %1291 = vmatprep.subr.mxu0 %v1117_v63 }
 0x22b   :  { %1292 = vmatpush3.msra.mxu0 %v1101_v19  ;;  %v1089_v51 = vmax.f32 %v943_v8, 0.0  ;;  %v1104_v63 = vmax.f32 %v1018_v1, 0.0 }
 0x22c   :  { %1293 = vmatprep.subr.mxu0 %v1116_v22  ;;  %v973_v22 = vadd.f32 %v2212_v29, %v2218_v23  ;;  %v963_v29 = vadd.f32 %v2200_v15, %v2224_v45  ;;  %v714_v35 = vpop.permute.xlu1 %713  ;;  %v1028_v15 = vadd.f32 %v2188_v2, %v804_v17  ;;  %v789_v45 = vpop.permute.xlu0 %788 }
 0x22d   :  { %1294 = vmatpush3.msra.mxu0 %v1100_v48  ;;  %v938_v2 = vadd.f32 %v2166_v44, %v714_v35  ;;  %v1013_v42 = vadd.f32 %v2168_v53, %v789_v45  ;;  %v1118_v48 = vld [vmem:[%s2275_s5] sm:$0xff] }
 0x22e   :  { %1295 = vmatprep.subr.mxu0 %v1115_v52  ;;  %v1095_v23 = vmax.f32 %v973_v22, 0.0  ;;  %v1093_v47 = vmax.f32 %v963_v29, 0.0  ;;  %v1106_v33 = vmax.f32 %v1028_v15, 0.0 }
 0x22f   :  { %1296 = vmatpush3.msra.mxu0 %v1099_v58  ;;  %v1088_v19 = vmax.f32 %v938_v2, 0.0  ;;  %v1103_v44 = vmax.f32 %v1013_v42, 0.0 }
 0x230   :  { %1297 = vmatprep.subr.mxu0 %v1114_v60  ;;  %v709_v6 = vpop.permute.xlu1 %708  ;;  %v784_v39 = vpop.permute.xlu0 %783 }
 0x231   :  { %1298 = vmatpush3.msra.mxu0 %v1098_v59  ;;  %v933_v41 = vadd.f32 %v2280_v61, %v709_v6  ;;  %v1008_v62 = vadd.f32 %v2281_v55, %v784_v39 }
 0x232   :  { %1299 = vmatprep.subr.mxu0 %v1113_v10 }
 0x233   :  { %1300 = vmatpush3.msra.mxu0 %v1097_v9  ;;  %v1087_v32 = vmax.f32 %v933_v41, 0.0  ;;  %v1102_v53 = vmax.f32 %v1008_v62, 0.0  ;;  %v1217_v9 = vlaneseq }
 0x234   :  { %1301 = vmatprep.subr.mxu0 %v1112_v50  ;;  %v704_v56 = vpop.permute.xlu1 %703  ;;  %v1124_v58 = vpop.permute.xlu0 %1123 }
 0x235   :  { %1302 = vmatpush3.msra.mxu0 %v1096_v20  ;;  %v928_v17 = vadd.f32 %v2282_v57, %v704_v56  ;;  %v1218_v25 = vshrl.u32 %v1217_v9, 7 }
 0x236   :  { %1303 = vmatprep.subr.mxu0 %v1111_v31 }
 0x237   :  { %1304 = vmatpush3.msra.mxu0 %v1095_v23  ;;  %v1086_v11 = vmax.f32 %v928_v17, 0.0  ;;  %vm1219_vm3 = vcmp.lt.s32.totalorder %v1218_v25, 4 }
 0x238   :  { %1305 = vmatprep.subr.mxu0 %v1110_v37 }
 0x239   :  { %1306 = vmatpush3.msra.mxu0 %v1094_v21 }
 0x23a   :  { %1307 = vmatprep.subr.mxu0 %v1109_v24 }
 0x23b   :  { %1308 = vmatpush3.msra.mxu0 %v1093_v47 }
 0x23c   :  { %1309 = vmatprep.subr.mxu0 %v1108_v49 }
 0x23d   :  { %1310 = vmatpush3.msra.mxu0 %v1092_v4 }
 0x23e   :  { %1311 = vmatprep.subr.mxu0 %v1107_v27 }
 0x23f   :  { %1312 = vmatpush3.msra.mxu0 %v1091_v28 }
 0x240   :  { %1313 = vmatprep.subr.mxu0 %v1106_v33 }
 0x241   :  { %1314 = vmatpush3.msra.mxu0 %v1090_v26 }
 0x242   :  { %1315 = vmatprep.subr.mxu0 %v1105_v36 }
 0x243   :  { %1316 = vmatpush3.msra.mxu0 %v1089_v51 }
 0x244   :  { %1317 = vmatprep.subr.mxu0 %v1104_v63 }
 0x245   :  { %1318 = vmatpush3.msra.mxu0 %v1088_v19 }
 0x246   :  { %1319 = vmatprep.subr.mxu0 %v1103_v44 }
 0x247   :  { %1320 = vmatpush3.msra.mxu0 %v1087_v32 }
 0x248   :  { %1321 = vmatprep.subr.mxu0 %v1102_v53 }
 0x249   :  { %1322 = vmatpush3.msra.mxu0 %v1086_v11 }
 0x24a   :  { %1191 = vmatmul.mubr.f32.vlgmr.msra.gmra.mxu0 %v1118_v48 }
 0x30a   :  { %v1323_v43 = vpop.f32.mrf.mxu0 }
 0x30c   :  { %v1324_v52 = vpop.f32.mrf.mxu0 }
 0x30d   :  { %v1325_v54 = vadd.f32 %v1324_v52, %v1323_v43 }
 0x30f   :  { %v1193_v5 = vadd.f32 %v1325_v54, %v1124_v58 }
 0x311   :  { %v1201_v60 = vand.u32 2147483647, %v1193_v5  ;;  %v1198_v20 = vmax.f32 %v1193_v5, 0.0  ;;  %vm1199_vm2 = vcmp.ne.f32.partialorder %v1193_v5, %v1193_v5 }
 0x313   :  { %v1202_v40 = vsub.f32 0.0, %v1201_v60 }
 0x315   :  { %v1203_v0 = vmul.f32 1.442695, %v1202_v40 }
 0x317   :  { %1444 = vpow2.f32 %v1203_v0 }
 0x324   :  { %v1445_v59 = vpop.eup %1444 }
 0x325   :  { %v1205_v3 = vadd.f32 1.0, %v1445_v59  ;;  %v1208_v46 = vmul.f32 -0.5, %v1445_v59  ;;  %v1211_v22 = vand.u32 2147483647, %v1445_v59 }
 0x327   :  { %1446 = vlog2.f32 %v1205_v3  ;;  %v1209_v10 = vadd.f32 1.0, %v1208_v46  ;;  %vm1212_vm1 = vcmp.lt.f32.partialorder %v1211_v22, 0.0004427343 }
 0x328   :  { %1448 = vtanh.f32 %v1193_v5 }
 0x329   :  { %v1210_v13 = vmul.f32 %v1445_v59, %v1209_v10 }
 0x334   :  { %v1447_v7 = vpop.eup %1446 }
 0x335   :  { %v1207_v50 = vmul.f32 0.6931472, %v1447_v7  ;;  %v1449_v34 = vpop.eup %1448 }
 0x336   :  { %v1197_v35 = vmul.f32 5.0, %v1449_v34 }
 0x337   :  { %v1213_v31 = vsel %vm1212_vm1, %v1210_v13, %v1207_v50 }
 0x338   :  { %v1214_v29 = vadd.f32 %v1213_v31, %v1198_v20 }
 0x33a   :  { %v1215_v23 = vsel %vm1199_vm2, %v1193_v5, %v1214_v29 }
 0x33b   :  { %v1216_v30 = vadd.f32 1e-05, %v1215_v23 }
 0x33d   :  { %v1220_v37 = vsel %vm1219_vm3, %v1197_v35, %v1216_v30 }
 0x33e   :  { %1221 = vst [vmem:[%s2276_s7] sm:$0xff] %v1220_v37 }

</bundles_post_ra>
